<compile_context>
chip_gen: v6e
topology: v6e:2x2x1
jax: 0.10.0
libtpu: 0.0.40
codegen_flags: <defaults>
</compile_context>

<pallas_src>
import jax
import jax.numpy as jnp
from jax.experimental import pallas as pl
from jax.experimental.pallas import tpu as pltpu


def text_encoder_kernel(x_ref, mask_ref, wbb_ref, bbb_ref, wfc_ref, bfc_ref,
                        watn_ref, batn_ref, out_ref):
    # x_ref:    [BT*L, E]  flattened token embeddings of this batch tile
    # mask_ref: [BT, L, 1] float mask (1.0 = valid token)
    # watn_ref: [1, D]     attention weight as a lane-dense row
    # batn_ref: (1,) f32   attention bias scalar (SMEM)
    # out_ref:  [BT, D]    L2-normalized pooled features
    BT, L, _ = mask_ref.shape

    x = x_ref[...]                                                 # [BT*L, E]

    # --- backbone proxy: linear E -> H, then F.relu (TextLearnableEncoder) ---
    # TODO(synk): the real BriVL backbone is a pretrained RoBERTa; replaced by
    # a single linear layer with deterministic synthetic weights.
    h = jnp.dot(x, wbb_ref[...], preferred_element_type=jnp.float32) + bbb_ref[...]
    h = jnp.maximum(h, 0.0)                                        # [BT*L, H]

    # --- learnable textFC: H -> D ---
    f = jnp.dot(h, wfc_ref[...], preferred_element_type=jnp.float32) + bfc_ref[...]
    D = f.shape[-1]
    f3 = f.reshape(BT, L, D)                                       # [BT, L, D]

    # --- masked attention pooling over the token axis (per example) ---
    mask = mask_ref[...]                                           # [BT, L, 1]
    # logits via lane reduce against the [1, D] row (not an N=1 MXU matmul)
    logits = jnp.sum(f3 * watn_ref[...], axis=-1, keepdims=True) + batn_ref[0]
    logits = jnp.where(mask > 0, logits, jnp.float32(-1e30))       # [BT, L, 1]
    logits = logits - jnp.max(logits, axis=1, keepdims=True)
    p = jnp.where(mask > 0, jnp.exp(logits), jnp.float32(0.0))     # [BT, L, 1]
    denom = jnp.sum(p, axis=1, keepdims=True)                      # [BT, 1, 1]
    # clamp so an all-masked row gives zeros instead of NaN
    attn = p * pl.reciprocal(jnp.maximum(denom, jnp.float32(1e-30)), approx=True)
    pooled = jnp.sum(attn * f3, axis=1)                            # [BT, D]

    # --- F.normalize(p=2, dim=-1) ---
    sq = jnp.sum(pooled * pooled, axis=-1, keepdims=True)          # [BT, 1]
    inv_norm = jax.lax.rsqrt(jnp.maximum(sq, jnp.float32(1e-24)))
    out_ref[...] = pooled * inv_norm


def init_params(key, vocab=100, embed_dim=128, hidden_dim=128, feat_dim=128):
    ks = jax.random.split(key, 7)
    s = 0.02
    return {
        "embedding": s * jax.random.normal(ks[0], (vocab, embed_dim), jnp.float32),
        "w_bb": s * jax.random.normal(ks[1], (embed_dim, hidden_dim), jnp.float32),
        "b_bb": s * jax.random.normal(ks[2], (1, hidden_dim), jnp.float32),
        "w_fc": s * jax.random.normal(ks[3], (hidden_dim, feat_dim), jnp.float32),
        "b_fc": s * jax.random.normal(ks[4], (1, feat_dim), jnp.float32),
        "w_atn": s * jax.random.normal(ks[5], (feat_dim, 1), jnp.float32),
        "b_atn": s * jax.random.normal(ks[6], (1, 1), jnp.float32),
    }


def text_model_forward(texts, mask_texts, params, batch_tile=None):
    """texts: int32 [B, L]; mask_texts: [B, L] (1 = valid token). Returns [B, D]."""
    B, L = texts.shape
    if batch_tile is None:
        batch_tile = B          # whole batch per grid step at small B
    BT = batch_tile
    if B % BT != 0:
        raise ValueError("batch_tile must divide B")
    num_tiles = B // BT

    # Embedding gather stays in plain JAX (glue for the backbone proxy).
    # TODO(synk): for a large real vocab, gather rows in-kernel via
    # scalar-prefetched token ids + manual DMA instead of materializing emb.
    emb = jnp.take(params["embedding"], texts, axis=0)             # [B, L, E]
    E = emb.shape[-1]
    H = params["w_bb"].shape[1]
    D = params["w_fc"].shape[1]

    x_flat = emb.reshape(B * L, E).astype(jnp.float32)             # [B*L, E]
    mask3 = mask_texts.astype(jnp.float32)[..., None]              # [B, L, 1]
    w_atn_row = params["w_atn"].reshape(1, D)                      # lane-dense row
    b_atn = params["b_atn"].reshape(1).astype(jnp.float32)         # SMEM scalar

    out = pl.pallas_call(
        text_encoder_kernel,
        out_shape=jax.ShapeDtypeStruct((B, D), jnp.float32),
        grid=(num_tiles,),
        in_specs=[
            pl.BlockSpec((BT * L, E), lambda b: (b, 0)),           # tokens (flattened)
            pl.BlockSpec((BT, L, 1), lambda b: (b, 0, 0)),         # token mask
            pl.BlockSpec((E, H), lambda b: (0, 0)),                # backbone-proxy weight
            pl.BlockSpec((1, H), lambda b: (0, 0)),                # backbone-proxy bias
            pl.BlockSpec((H, D), lambda b: (0, 0)),                # textFC weight
            pl.BlockSpec((1, D), lambda b: (0, 0)),                # textFC bias
            pl.BlockSpec((1, D), lambda b: (0, 0)),                # attention weight row
            pl.BlockSpec(memory_space=pltpu.MemorySpace.SMEM),     # attention bias scalar
        ],
        out_specs=pl.BlockSpec((BT, D), lambda b: (b, 0)),
        compiler_params=pltpu.CompilerParams(
            dimension_semantics=("parallel",)),
    )(x_flat, mask3, params["w_bb"], params["b_bb"], params["w_fc"],
      params["b_fc"], w_atn_row, b_atn)
    return out                                                     # [B, D]


def text_model_reference(texts, mask_texts, params):
    """Pure-JAX reference for correctness checking."""
    emb = jnp.take(params["embedding"], texts, axis=0)
    mask = mask_texts.astype(jnp.float32)[..., None]               # [B, L, 1]
    h = jnp.maximum(emb @ params["w_bb"] + params["b_bb"], 0.0)
    f = h @ params["w_fc"] + params["b_fc"]                        # [B, L, D]
    logits = f @ params["w_atn"] + params["b_atn"]                 # [B, L, 1]
    logits = jnp.where(mask > 0, logits, -1e30)
    logits = logits - jnp.max(logits, axis=1, keepdims=True)
    expw = jnp.where(mask > 0, jnp.exp(logits), 0.0)
    attn = expw / jnp.maximum(jnp.sum(expw, axis=1, keepdims=True), 1e-30)
    pooled = jnp.sum(attn * f, axis=1)                             # [B, D]
    norm = jnp.sqrt(jnp.sum(pooled * pooled, axis=-1, keepdims=True))
    return pooled / jnp.maximum(norm, 1e-12)


if __name__ == "__main__":
    key = jax.random.PRNGKey(0)
    k_param, k_tok = jax.random.split(key)

    B, L = 2, 8
    VOCAB, E, H, D = 100, 128, 128, 128

    params = init_params(k_param, vocab=VOCAB, embed_dim=E, hidden_dim=H, feat_dim=D)

    texts = jax.random.randint(k_tok, (B, L), 0, VOCAB, dtype=jnp.int32)
    # first 5 / 7 tokens valid per batch element
    lengths = jnp.array([5, 7], dtype=jnp.int32)
    mask_texts = (jnp.arange(L)[None, :] < lengths[:, None]).astype(jnp.int32)

    out = text_model_forward(texts, mask_texts, params)
    out = jax.block_until_ready(out)

    ref = text_model_reference(texts, mask_texts, params)
    assert out.shape == (B, D)
    assert bool(jnp.all(jnp.isfinite(out)))
    # output rows are L2-normalized
    assert bool(jnp.allclose(jnp.linalg.norm(out, axis=-1), 1.0, atol=1e-3))
    assert bool(jnp.allclose(out, ref, atol=1e-3, rtol=1e-3))

    print("KERNEL_OK")
</pallas_src>

<mosaic_0001>
module attributes {stable_mosaic.version = 11 : i64} {
  func.func @text_encoder_kernel(%arg0: i32, %arg1: memref<16x128xf32, #tpu.memory_space<vmem>>, %arg2: memref<2x8x1xf32, #tpu.memory_space<vmem>>, %arg3: memref<128x128xf32, #tpu.memory_space<vmem>>, %arg4: memref<1x128xf32, #tpu.memory_space<vmem>>, %arg5: memref<128x128xf32, #tpu.memory_space<vmem>>, %arg6: memref<1x128xf32, #tpu.memory_space<vmem>>, %arg7: memref<1x128xf32, #tpu.memory_space<vmem>>, %arg8: memref<1xf32, #tpu.memory_space<smem>>, %arg9: memref<2x128xf32, #tpu.memory_space<vmem>>) attributes {dimension_semantics = [#tpu.dimension_semantics<parallel>], iteration_bounds = array<i64: 1>, scalar_prefetch = 0 : i64, scratch_operands = 0 : i64, tpu.core_type = #tpu.core_type<tc>, window_params = [{transform_indices = @transform_0, window_bounds = array<i64: 16, 128>}, {transform_indices = @transform_1, window_bounds = array<i64: 2, 8, 1>}, {pipeline_mode = #tpu.pipeline_mode<synchronous>, transform_indices = @transform_2, window_bounds = array<i64: 128, 128>}, {pipeline_mode = #tpu.pipeline_mode<synchronous>, transform_indices = @transform_3, window_bounds = array<i64: 1, 128>}, {pipeline_mode = #tpu.pipeline_mode<synchronous>, transform_indices = @transform_4, window_bounds = array<i64: 128, 128>}, {pipeline_mode = #tpu.pipeline_mode<synchronous>, transform_indices = @transform_5, window_bounds = array<i64: 1, 128>}, {pipeline_mode = #tpu.pipeline_mode<synchronous>, transform_indices = @transform_6, window_bounds = array<i64: 1, 128>}, {transform_indices = @transform_7, window_bounds = array<i64: 1>}, {transform_indices = @transform_8, window_bounds = array<i64: 2, 128>}]} {
    %c0 = arith.constant 0 : index
    %c0_0 = arith.constant 0 : index
    %0 = vector.load %arg1[%c0, %c0_0] : memref<16x128xf32, #tpu.memory_space<vmem>>, vector<16x128xf32>
    %c0_1 = arith.constant 0 : index
    %c0_2 = arith.constant 0 : index
    %1 = vector.load %arg3[%c0_1, %c0_2] : memref<128x128xf32, #tpu.memory_space<vmem>>, vector<128x128xf32>
    %cst = arith.constant dense<0.000000e+00> : vector<16x128xf32>
    %2 = tpu.matmul %0, %1, %cst {dimension_numbers = #tpu.dot_dimension_numbers<[1], [0], [0], [1], [0, 0, 1, 1], [], []>} : vector<16x128xf32>, vector<128x128xf32>, vector<16x128xf32> -> vector<16x128xf32>
    %c0_3 = arith.constant 0 : index
    %c0_4 = arith.constant 0 : index
    %3 = vector.load %arg4[%c0_3, %c0_4] : memref<1x128xf32, #tpu.memory_space<vmem>>, vector<1x128xf32>
    %4 = vector.broadcast %3 : vector<1x128xf32> to vector<16x128xf32>
    %5 = arith.addf %2, %4 : vector<16x128xf32>
    %cst_5 = arith.constant 0.000000e+00 : f32
    %6 = vector.broadcast %cst_5 : f32 to vector<16x128xf32>
    %7 = arith.maximumf %5, %6 : vector<16x128xf32>
    %c0_6 = arith.constant 0 : index
    %c0_7 = arith.constant 0 : index
    %8 = vector.load %arg5[%c0_6, %c0_7] : memref<128x128xf32, #tpu.memory_space<vmem>>, vector<128x128xf32>
    %cst_8 = arith.constant dense<0.000000e+00> : vector<16x128xf32>
    %9 = tpu.matmul %7, %8, %cst_8 {dimension_numbers = #tpu.dot_dimension_numbers<[1], [0], [0], [1], [0, 0, 1, 1], [], []>} : vector<16x128xf32>, vector<128x128xf32>, vector<16x128xf32> -> vector<16x128xf32>
    %c0_9 = arith.constant 0 : index
    %c0_10 = arith.constant 0 : index
    %10 = vector.load %arg6[%c0_9, %c0_10] : memref<1x128xf32, #tpu.memory_space<vmem>>, vector<1x128xf32>
    %11 = vector.broadcast %10 : vector<1x128xf32> to vector<16x128xf32>
    %12 = arith.addf %9, %11 : vector<16x128xf32>
    %13 = vector.shape_cast %12 : vector<16x128xf32> to vector<2x8x128xf32>
    %c0_11 = arith.constant 0 : index
    %c0_12 = arith.constant 0 : index
    %c0_13 = arith.constant 0 : index
    %14 = vector.load %arg2[%c0_11, %c0_12, %c0_13] : memref<2x8x1xf32, #tpu.memory_space<vmem>>, vector<2x8x1xf32>
    %c0_14 = arith.constant 0 : index
    %c0_15 = arith.constant 0 : index
    %15 = vector.load %arg7[%c0_14, %c0_15] : memref<1x128xf32, #tpu.memory_space<vmem>>, vector<1x128xf32>
    %16 = vector.shape_cast %15 : vector<1x128xf32> to vector<1x1x128xf32>
    %17 = vector.broadcast %16 : vector<1x1x128xf32> to vector<2x8x128xf32>
    %18 = arith.mulf %13, %17 : vector<2x8x128xf32>
    %cst_16 = arith.constant dense<0.000000e+00> : vector<2x8xf32>
    %19 = vector.multi_reduction <add>, %18, %cst_16 [2] : vector<2x8x128xf32> to vector<2x8xf32>
    %20 = vector.shape_cast %19 : vector<2x8xf32> to vector<2x8x1xf32>
    %c0_17 = arith.constant 0 : index
    %21 = memref.load %arg8[%c0_17] : memref<1xf32, #tpu.memory_space<smem>>
    %22 = vector.broadcast %21 : f32 to vector<2x8x1xf32>
    %23 = arith.addf %20, %22 : vector<2x8x1xf32>
    %cst_18 = arith.constant 0.000000e+00 : f32
    %24 = vector.broadcast %cst_18 : f32 to vector<2x8x1xf32>
    %25 = arith.cmpf ogt, %14, %24 : vector<2x8x1xf32>
    %cst_19 = arith.constant -1.000000e+30 : f32
    %26 = vector.broadcast %cst_19 : f32 to vector<2x8x1xf32>
    %27 = arith.select %25, %23, %26 : vector<2x8x1xi1>, vector<2x8x1xf32>
    %cst_20 = arith.constant dense<0xFF800000> : vector<2x1xf32>
    %28 = vector.multi_reduction <maximumf>, %27, %cst_20 [1] : vector<2x8x1xf32> to vector<2x1xf32>
    %29 = vector.shape_cast %28 : vector<2x1xf32> to vector<2x1x1xf32>
    %30 = vector.broadcast %29 : vector<2x1x1xf32> to vector<2x8x1xf32>
    %31 = arith.subf %27, %30 : vector<2x8x1xf32>
    %cst_21 = arith.constant 0.000000e+00 : f32
    %32 = vector.broadcast %cst_21 : f32 to vector<2x8x1xf32>
    %33 = arith.cmpf ogt, %14, %32 : vector<2x8x1xf32>
    %34 = math.exp %31 : vector<2x8x1xf32>
    %cst_22 = arith.constant 0.000000e+00 : f32
    %35 = vector.broadcast %cst_22 : f32 to vector<2x8x1xf32>
    %36 = arith.select %33, %34, %35 : vector<2x8x1xi1>, vector<2x8x1xf32>
    %cst_23 = arith.constant dense<0.000000e+00> : vector<2x1xf32>
    %37 = vector.multi_reduction <add>, %36, %cst_23 [1] : vector<2x8x1xf32> to vector<2x1xf32>
    %38 = vector.shape_cast %37 : vector<2x1xf32> to vector<2x1x1xf32>
    %cst_24 = arith.constant 1.000000e-30 : f32
    %39 = vector.broadcast %cst_24 : f32 to vector<2x1x1xf32>
    %40 = arith.maximumf %38, %39 : vector<2x1x1xf32>
    %41 = tpu.reciprocal %40 {approx = true} : vector<2x1x1xf32> -> vector<2x1x1xf32>
    %42 = vector.broadcast %41 : vector<2x1x1xf32> to vector<2x8x1xf32>
    %43 = arith.mulf %36, %42 : vector<2x8x1xf32>
    %44 = vector.broadcast %43 : vector<2x8x1xf32> to vector<2x8x128xf32>
    %45 = arith.mulf %44, %13 : vector<2x8x128xf32>
    %cst_25 = arith.constant dense<0.000000e+00> : vector<2x128xf32>
    %46 = vector.multi_reduction <add>, %45, %cst_25 [1] : vector<2x8x128xf32> to vector<2x128xf32>
    %47 = arith.mulf %46, %46 : vector<2x128xf32>
    %cst_26 = arith.constant dense<0.000000e+00> : vector<2xf32>
    %48 = vector.multi_reduction <add>, %47, %cst_26 [1] : vector<2x128xf32> to vector<2xf32>
    %49 = vector.shape_cast %48 : vector<2xf32> to vector<2x1xf32>
    %cst_27 = arith.constant 1.000000e-24 : f32
    %50 = vector.broadcast %cst_27 : f32 to vector<2x1xf32>
    %51 = arith.maximumf %49, %50 : vector<2x1xf32>
    %52 = math.rsqrt %51 : vector<2x1xf32>
    %53 = vector.broadcast %52 : vector<2x1xf32> to vector<2x128xf32>
    %54 = arith.mulf %46, %53 : vector<2x128xf32>
    %c0_28 = arith.constant 0 : index
    %c0_29 = arith.constant 0 : index
    %55 = vector.load %arg9[%c0_28, %c0_29] : memref<2x128xf32, #tpu.memory_space<vmem>>, vector<2x128xf32>
    tpu.vector_store %arg9[%c0_28, %c0_29], %54 {strides = array<i32>} : memref<2x128xf32, #tpu.memory_space<vmem>>, vector<2x128xf32>,
    return
  }
  func.func @transform_0(%arg0: i32) -> (i32, i32) {
    %c0_i32 = arith.constant 0 : i32
    %c0_i32_0 = arith.constant 0 : i32
    return %arg0, %c0_i32 : i32, i32
  }
  func.func @transform_1(%arg0: i32) -> (i32, i32, i32) {
    %c0_i32 = arith.constant 0 : i32
    %c0_i32_0 = arith.constant 0 : i32
    %c0_i32_1 = arith.constant 0 : i32
    return %arg0, %c0_i32, %c0_i32_0 : i32, i32, i32
  }
  func.func @transform_2(%arg0: i32) -> (i32, i32) {
    %c0_i32 = arith.constant 0 : i32
    %c0_i32_0 = arith.constant 0 : i32
    %c0_i32_1 = arith.constant 0 : i32
    return %c0_i32, %c0_i32_0 : i32, i32
  }
  func.func @transform_3(%arg0: i32) -> (i32, i32) {
    %c0_i32 = arith.constant 0 : i32
    %c0_i32_0 = arith.constant 0 : i32
    %c0_i32_1 = arith.constant 0 : i32
    return %c0_i32, %c0_i32_0 : i32, i32
  }
  func.func @transform_4(%arg0: i32) -> (i32, i32) {
    %c0_i32 = arith.constant 0 : i32
    %c0_i32_0 = arith.constant 0 : i32
    %c0_i32_1 = arith.constant 0 : i32
    return %c0_i32, %c0_i32_0 : i32, i32
  }
  func.func @transform_5(%arg0: i32) -> (i32, i32) {
    %c0_i32 = arith.constant 0 : i32
    %c0_i32_0 = arith.constant 0 : i32
    %c0_i32_1 = arith.constant 0 : i32
    return %c0_i32, %c0_i32_0 : i32, i32
  }
  func.func @transform_6(%arg0: i32) -> (i32, i32) {
    %c0_i32 = arith.constant 0 : i32
    %c0_i32_0 = arith.constant 0 : i32
    %c0_i32_1 = arith.constant 0 : i32
    return %c0_i32, %c0_i32_0 : i32, i32
  }
  func.func @transform_7(%arg0: i32) -> i32 {
    %c0_i32 = arith.constant 0 : i32
    %c0_i32_0 = arith.constant 0 : i32
    return %c0_i32 : i32
  }
  func.func @transform_8(%arg0: i32) -> (i32, i32) {
    %c0_i32 = arith.constant 0 : i32
    %c0_i32_0 = arith.constant 0 : i32
    return %arg0, %c0_i32 : i32, i32
  }
}

</mosaic_0001>

<bundles_post_ra>
// kernel: tpu_custom_call.1
= control target key start
LH: loop header
LB: loop body
LE: loop exit
PB: predicated region body
PF: predicated region fallthrough
CT: control target
= control target key end

     0   :  { %14 = vsyncpa [#allocation4], 0  ;;  %s685_s0 = inlined_call_operand.vmem [shape: f32[16,128], index: 0, kind: input, shape index: {}]   ;;  %s686_s1 = inlined_call_operand.vmem [shape: f32[2,8,1], index: 1, kind: input, shape index: {}]   ;;  %s687_s2 = inlined_call_operand.hbm [shape: f32[128,128], index: 2, kind: input, shape index: {}]   ;;  %s688_s3 = inlined_call_operand.vmem [shape: f32[1,128], index: 3, kind: input, shape index: {}]   ;;  %s689_s4 = inlined_call_operand.hbm [shape: f32[128,128], index: 4, kind: input, shape index: {}]   ;;  %s690_s5 = inlined_call_operand.vmem [shape: f32[1,128], index: 5, kind: input, shape index: {}]   ;;  %s691_s6 = inlined_call_operand.vmem [shape: f32[1,128], index: 6, kind: input, shape index: {}]   ;;  %s692_s7 = inlined_call_operand.<no memory space> [shape: f32[1], index: 7, kind: input, shape index: {}]   ;;  %s693_s8 = inlined_call_operand.hbm [shape: f32[2,128], index: 8, kind: output, shape index: {}]  }
   0x1   :  { %15 = vsyncpa [#allocation7], 0 }
   0x2   :  { %16 = vsyncpa [#allocation5], 0  ;;  %s583_s27 = smov [#allocation3]  }
   0x3   :  { %s26_s28 = sshll.u32 %s583_s27, 4  ;;  %s27_s28 = int_to_ptr.vmem [resolvable:$true] %s26_s28 }
   0x4   :  { %s525_s29 = scalar_lea.vmem %s27_s28, 2048  ;;  %p530_p1 = scmp.lt.s32.totalorder %s27_s28, %s27_s28 }
   0x5   :  { %p526_p0 = scmp.ne.s32.totalorder %s27_s28, %s525_s29  ;;  %p531_p2 = scmp.lt.s32.totalorder %s525_s29, %s525_s29 }
   0x7   :  { %p532_p3 = por %p531_p2, %p530_p1 }
   0x9   :  { %p533_p4 = pnand %p532_p3, %p526_p0 }
   0xb   :  { %536 = shalt.err (!%p533_p4)
}
   0xc   :  { %s584_s30 = smov 128   ;;  %s585_s9 = smov 8  }
   0xd   :  { %32 = dma.hbm_to_vmem [thread:$0]  %s687_s2, 2048, %s27_s28, [#allocation4], %s584_s30, %s584_s30, %s585_s9  }
   0xe   :  { %s586_s12 = smov [#allocation6]  }
   0xf   :  { %s40_s13 = sshll.u32 %s586_s12, 4  ;;  %s41_s13 = int_to_ptr.vmem [resolvable:$true] %s40_s13 }
  0x10   :  { %s545_s14 = scalar_lea.vmem %s41_s13, 2048  ;;  %p550_p6 = scmp.lt.s32.totalorder %s41_s13, %s41_s13 }
  0x11   :  { %p546_p5 = scmp.ne.s32.totalorder %s41_s13, %s545_s14  ;;  %p551_p7 = scmp.lt.s32.totalorder %s545_s14, %s545_s14 }
  0x13   :  { %p552_p8 = por %p551_p7, %p550_p6 }
  0x15   :  { %p553_p9 = pnand %p552_p8, %p546_p5 }
  0x17   :  { %556 = shalt.err (!%p553_p9)
}
  0x18   :  { %46 = dma.hbm_to_vmem [thread:$0]  %s689_s4, 2048, %s41_s13, [#allocation7], %s584_s30, %s584_s30, %s585_s9  }
  0x19   :  { %577 = dma.done.wait [#allocation4], 2048  }
  0x1a   :  { %578 = vsyncadd [#allocation4], 4294965248 }
  0x1b   :  { %579 = dma.done.wait [#allocation7], 2048  }
  0x1c   :  { %580 = vsyncadd [#allocation7], 4294965248  ;;  %v76_v0 = vld [vmem:[#allocation3 + $0x78] sm:$0xff]  ;;  %v75_v1 = vld [vmem:[#allocation3 + $0x70] sm:$0xff]  ;;  %v587_v49 = vmov 0   ;;  %v275_v51 = vstv %s692_s7  ;;  %vm282_vm1 = vcmask 7168  }
  0x1d   :  { %429 = vmatprep.subr.mxu0 %v76_v0  ;;  %v74_v2 = vld [vmem:[#allocation3 + $0x68] sm:$0xff]  ;;  %v73_v3 = vld [vmem:[#allocation3 + $0x60] sm:$0xff]  ;;  %v72_v5 = vld [vmem:[#allocation3 + $0x58] sm:$0xff]  ;;  %505 = vset.pattern.permute.xlu1 %v587_v49  ;;  %vm353_vm3 = vcmask 1041409   ;;  %vm356_vm4 = vcmask 1041408  }
  0x1e   :  { %430 = vmatpush3.msra.mxu0 %v76_v0  ;;  %v59_v4 = vld [vmem:[%s685_s0] sm:$0xff]  ;;  %v176_v6 = vld [vmem:[#allocation6 + $0x78] sm:$0xff]  ;;  %v175_v7 = vld [vmem:[#allocation6 + $0x70] sm:$0xff]  ;;  %506 = vset.pattern.permute.xlu0 %v587_v49 }
  0x1f   :  { %431 = vmatprep.subr.mxu0 %v75_v1  ;;  %461 = vmatprep.mubr.f32.mxu0 %v59_v4  ;;  %v71_v8 = vld [vmem:[#allocation3 + $0x50] sm:$0xff]  ;;  %v174_v9 = vld [vmem:[#allocation6 + $0x68] sm:$0xff]  ;;  %v173_v11 = vld [vmem:[#allocation6 + $0x60] sm:$0xff] }
  0x20   :  { %432 = vmatpush3.msra.mxu0 %v75_v1  ;;  %464 = vmatprep.subr.mxu1 %v176_v6  ;;  %v70_v10 = vld [vmem:[#allocation3 + $0x48] sm:$0xff]  ;;  %v69_v12 = vld [vmem:[#allocation3 + $0x40] sm:$0xff]  ;;  %v172_v13 = vld [vmem:[#allocation6 + $0x58] sm:$0xff] }
  0x21   :  { %433 = vmatprep.subr.mxu0 %v74_v2  ;;  %465 = vmatpush3.msra.mxu1 %v176_v6  ;;  %v68_v14 = vld [vmem:[#allocation3 + $0x38] sm:$0xff]  ;;  %v171_v15 = vld [vmem:[#allocation6 + $0x50] sm:$0xff]  ;;  %v170_v17 = vld [vmem:[#allocation6 + $0x48] sm:$0xff] }
  0x22   :  { %434 = vmatpush3.msra.mxu0 %v74_v2  ;;  %466 = vmatprep.subr.mxu1 %v175_v7  ;;  %v67_v16 = vld [vmem:[#allocation3 + $0x30] sm:$0xff]  ;;  %v66_v18 = vld [vmem:[#allocation3 + $0x28] sm:$0xff]  ;;  %v169_v19 = vld [vmem:[#allocation6 + $0x40] sm:$0xff] }
  0x23   :  { %435 = vmatprep.subr.mxu0 %v73_v3  ;;  %467 = vmatpush3.msra.mxu1 %v175_v7  ;;  %v65_v20 = vld [vmem:[#allocation3 + $0x20] sm:$0xff]  ;;  %v168_v21 = vld [vmem:[#allocation6 + $0x38] sm:$0xff]  ;;  %v167_v23 = vld [vmem:[#allocation6 + $0x30] sm:$0xff] }
  0x24   :  { %436 = vmatpush3.msra.mxu0 %v73_v3  ;;  %468 = vmatprep.subr.mxu1 %v174_v9  ;;  %v64_v22 = vld [vmem:[#allocation3 + $0x18] sm:$0xff]  ;;  %v63_v24 = vld [vmem:[#allocation3 + $0x10] sm:$0xff]  ;;  %v166_v25 = vld [vmem:[#allocation6 + $0x28] sm:$0xff] }
  0x25   :  { %437 = vmatprep.subr.mxu0 %v72_v5  ;;  %469 = vmatpush3.msra.mxu1 %v174_v9  ;;  %v62_v26 = vld [vmem:[#allocation3 + $0x8] sm:$0xff]  ;;  %v165_v27 = vld [vmem:[#allocation6 + $0x20] sm:$0xff]  ;;  %v164_v30 = vld [vmem:[#allocation6 + $0x18] sm:$0xff] }
  0x26   :  { %438 = vmatpush3.msra.mxu0 %v72_v5  ;;  %470 = vmatprep.subr.mxu1 %v173_v11  ;;  %v61_v28 = vld [vmem:[#allocation3] sm:$0xff]  ;;  %v60_v29 = vld [vmem:[%s685_s0 + $0x8] sm:$0xff]  ;;  %v163_v31 = vld [vmem:[#allocation6 + $0x10] sm:$0xff] }
  0x27   :  { %439 = vmatprep.subr.mxu0 %v71_v8  ;;  %471 = vmatpush3.msra.mxu1 %v173_v11  ;;  %v162_v32 = vld [vmem:[#allocation6 + $0x8] sm:$0xff]  ;;  %v161_v33 = vld [vmem:[#allocation6] sm:$0xff] }
  0x28   :  { %440 = vmatpush3.msra.mxu0 %v71_v8  ;;  %472 = vmatprep.subr.mxu1 %v172_v13  ;;  %v390_v34 = vld [vmem:[%s688_s3] ss:$0 sm:$0xff]  ;;  %v260_v54 = vld [vmem:[%s686_s1 + $0x8] sm:$0xff] }
  0x29   :  { %441 = vmatprep.subr.mxu0 %v70_v10  ;;  %473 = vmatpush3.msra.mxu1 %v172_v13  ;;  %v391_v42 = vld [vmem:[%s690_s5] ss:$0 sm:$0xff]  ;;  %vm279_vm2 = vcmp.gt.f32.partialorder %v260_v54, 0.0 }
  0x2a   :  { %442 = vmatpush3.msra.mxu0 %v70_v10  ;;  %474 = vmatprep.subr.mxu1 %v171_v15  ;;  %v392_v45 = vld [vmem:[%s691_s6] ss:$0 sm:$0xff] }
  0x2b   :  { %443 = vmatprep.subr.mxu0 %v69_v12  ;;  %475 = vmatpush3.msra.mxu1 %v171_v15  ;;  %v259_v50 = vld [vmem:[%s686_s1] sm:$0xff]  ;;  %s588_s1 = smov [#allocation8]  }
  0x2c   :  { %444 = vmatpush3.msra.mxu0 %v69_v12  ;;  %476 = vmatprep.subr.mxu1 %v170_v17  ;;  %vm278_vm0 = vcmp.gt.f32.partialorder %v259_v50, 0.0  ;;  %s380_s7 = sshll.u32 %s588_s1, 4  ;;  %s381_s7 = int_to_ptr.vmem [resolvable:$true] %s380_s7 }
  0x2d   :  { %445 = vmatprep.subr.mxu0 %v68_v14  ;;  %477 = vmatpush3.msra.mxu1 %v170_v17  ;;  %s557_s27 = scalar_lea.vmem %s381_s7, 32  ;;  %p562_p11 = scmp.lt.s32.totalorder %s381_s7, %s381_s7 }
  0x2e   :  { %446 = vmatpush3.msra.mxu0 %v68_v14  ;;  %478 = vmatprep.subr.mxu1 %v169_v19  ;;  %p558_p10 = scmp.ne.s32.totalorder %s381_s7, %s557_s27  ;;  %p563_p12 = scmp.lt.s32.totalorder %s557_s27, %s557_s27 }
  0x2f   :  { %447 = vmatprep.subr.mxu0 %v67_v16  ;;  %479 = vmatpush3.msra.mxu1 %v169_v19 }
  0x30   :  { %448 = vmatpush3.msra.mxu0 %v67_v16  ;;  %480 = vmatprep.subr.mxu1 %v168_v21  ;;  %p564_p13 = por %p563_p12, %p562_p11 }
  0x31   :  { %449 = vmatprep.subr.mxu0 %v66_v18  ;;  %481 = vmatpush3.msra.mxu1 %v168_v21 }
  0x32   :  { %450 = vmatpush3.msra.mxu0 %v66_v18  ;;  %482 = vmatprep.subr.mxu1 %v167_v23  ;;  %p565_p0 = pnand %p564_p13, %p558_p10 }
  0x33   :  { %451 = vmatprep.subr.mxu0 %v65_v20  ;;  %483 = vmatpush3.msra.mxu1 %v167_v23 }
  0x34   :  { %452 = vmatpush3.msra.mxu0 %v65_v20  ;;  %484 = vmatprep.subr.mxu1 %v166_v25 }
  0x35   :  { %453 = vmatprep.subr.mxu0 %v64_v22  ;;  %485 = vmatpush3.msra.mxu1 %v166_v25 }
  0x36   :  { %454 = vmatpush3.msra.mxu0 %v64_v22  ;;  %486 = vmatprep.subr.mxu1 %v165_v27 }
  0x37   :  { %455 = vmatprep.subr.mxu0 %v63_v24  ;;  %487 = vmatpush3.msra.mxu1 %v165_v27 }
  0x38   :  { %456 = vmatpush3.msra.mxu0 %v63_v24  ;;  %488 = vmatprep.subr.mxu1 %v164_v30 }
  0x39   :  { %457 = vmatprep.subr.mxu0 %v62_v26  ;;  %489 = vmatpush3.msra.mxu1 %v164_v30 }
  0x3a   :  { %458 = vmatpush3.msra.mxu0 %v62_v26  ;;  %490 = vmatprep.subr.mxu1 %v163_v31 }
  0x3b   :  { %459 = vmatprep.subr.mxu0 %v61_v28  ;;  %491 = vmatpush3.msra.mxu1 %v163_v31 }
  0x3c   :  { %460 = vmatpush3.msra.mxu0 %v61_v28  ;;  %492 = vmatprep.subr.mxu1 %v162_v32 }
  0x3d   :  { %462 = vmatmul.mubr.f32.vlgmr.msra.gmra.mxu0 %v60_v29  ;;  %493 = vmatpush3.msra.mxu1 %v162_v32 }
  0x3e   :  { %494 = vmatprep.subr.mxu1 %v161_v33 }
  0x3f   :  { %495 = vmatpush3.msra.mxu1 %v161_v33 }
  0xfd   :  { %v463_v35 = vpop.f32.mrf.mxu0 }
  0xfe   :  { %v156_v36 = vadd.f32 %v463_v35, %v390_v34 }
  0xff   :  { %v150_v37 = vpop.f32.mrf.mxu0 }
 0x100   :  { %v151_v38 = vadd.f32 %v390_v34, %v150_v37  ;;  %v160_v40 = vmax.f32 %v156_v36, 0.0 }
 0x102   :  { %v159_v39 = vmax.f32 %v151_v38, 0.0 }
 0x104   :  { %496 = vmatprep.mubr.f32.mxu1 %v159_v39 }
 0x105   :  { %497 = vmatmul.mubr.f32.vlgmr.msra.gmra.mxu1 %v160_v40 }
 0x1c5   :  { %v498_v41 = vpop.f32.mrf.mxu1 }
 0x1c6   :  { %v657_v46 = vadd.f32 %v498_v41, %v391_v42 }
 0x1c7   :  { %v250_v43 = vpop.f32.mrf.mxu1 }
 0x1c8   :  { %v652_v44 = vadd.f32 %v391_v42, %v250_v43  ;;  %v269_v48 = vmul.f32 %v392_v45, %v657_v46 }
 0x1ca   :  { %v268_v47 = vmul.f32 %v392_v45, %v652_v44 }
 0x1cc   :  { %270 = vadd.xlane.f32.xlu0 %v268_v47 }
 0x1d0   :  { %272 = vadd.xlane.f32.xlu0 %v269_v48 }
 0x255   :  { %v271_v52 = vpop.xlane.xlu0 %270 }
 0x256   :  { %v276_v53 = vadd.f32 %v275_v51, %v271_v52 }
 0x258   :  { %v280_v55 = vsel %vm278_vm0, %v276_v53, -1e+30 }
 0x259   :  { %v283_v56 = vsel %vm282_vm1, %v280_v55, -inf  ;;  %v273_v57 = vpop.xlane.xlu0 %272 }
 0x25a   :  { %v284_v58 = vrot.slane %v283_v56, 4  ;;  %v277_v59 = vadd.f32 %v275_v51, %v273_v57 }
 0x25c   :  { %v285_v60 = vmax.f32 %v283_v56, %v284_v58  ;;  %v281_v61 = vsel %vm279_vm2, %v277_v59, -1e+30 }
 0x25d   :  { %v290_v62 = vsel %vm282_vm1, %v281_v61, -inf }
 0x25e   :  { %v286_v63 = vrot.slane %v285_v60, 2  ;;  %v291_v0 = vrot.slane %v290_v62, 4 }
 0x260   :  { %v287_v1 = vmax.f32 %v285_v60, %v286_v63  ;;  %v292_v2 = vmax.f32 %v290_v62, %v291_v0 }
 0x262   :  { %v288_v3 = vrot.slane %v287_v1, 1  ;;  %v293_v4 = vrot.slane %v292_v2, 2 }
 0x264   :  { %v289_v5 = vmax.f32 %v287_v1, %v288_v3  ;;  %v294_v6 = vmax.f32 %v292_v2, %v293_v4 }
 0x266   :  { %v297_v7 = vsub.f32 %v280_v55, %v289_v5  ;;  %v295_v8 = vrot.slane %v294_v6, 1 }
 0x268   :  { %v299_v9 = vmul.f32 1.442695, %v297_v7  ;;  %v296_v10 = vmax.f32 %v294_v6, %v295_v8 }
 0x26a   :  { %507 = vpow2.f32 %v299_v9  ;;  %v298_v11 = vsub.f32 %v281_v61, %v296_v10 }
 0x26c   :  { %v301_v12 = vmul.f32 1.442695, %v298_v11 }
 0x26e   :  { %509 = vpow2.f32 %v301_v12 }
 0x277   :  { %v508_v13 = vpop.eup %507 }
 0x278   :  { %v303_v14 = vsel %vm278_vm0, %v508_v13, 0.0 }
 0x279   :  { %v305_v15 = vsel %vm282_vm1, %v303_v14, 0.0 }
 0x27a   :  { %v306_v16 = vrot.slane %v305_v15, 4 }
 0x27b   :  { %v510_v17 = vpop.eup %509 }
 0x27c   :  { %v304_v18 = vsel %vm279_vm2, %v510_v17, 0.0  ;;  %v307_v19 = vadd.f32 %v306_v16, %v305_v15 }
 0x27d   :  { %v312_v20 = vsel %vm282_vm1, %v304_v18, 0.0 }
 0x27e   :  { %v313_v21 = vrot.slane %v312_v20, 4  ;;  %v308_v22 = vrot.slane %v307_v19, 2 }
 0x280   :  { %v314_v23 = vadd.f32 %v313_v21, %v312_v20  ;;  %v309_v24 = vadd.f32 %v308_v22, %v307_v19 }
 0x282   :  { %v315_v25 = vrot.slane %v314_v23, 2  ;;  %v310_v26 = vrot.slane %v309_v24, 1 }
 0x284   :  { %v316_v27 = vadd.f32 %v315_v25, %v314_v23  ;;  %v311_v28 = vadd.f32 %v310_v26, %v309_v24 }
 0x286   :  { %v317_v29 = vrot.slane %v316_v27, 1  ;;  %v319_v30 = vmax.f32 %v311_v28, 1e-30 }
 0x288   :  { %v318_v31 = vadd.f32 %v317_v29, %v316_v27  ;;  %511 = vrcp.f32 %v319_v30 }
 0x28a   :  { %v320_v32 = vmax.f32 %v318_v31, 1e-30 }
 0x28c   :  { %513 = vrcp.f32 %v320_v32 }
 0x295   :  { %v512_v33 = vpop.eup %511 }
 0x296   :  { %v323_v34 = vmul.f32 %v512_v33, %v303_v14 }
 0x298   :  { %327 = vperm.xlu1 %505, %v323_v34  }
 0x299   :  { %v514_v35 = vpop.eup %513 }
 0x29a   :  { %v324_v36 = vmul.f32 %v514_v35, %v304_v18 }
 0x29c   :  { %332 = vperm.xlu1 %505, %v324_v36  }
 0x313   :  { %v328_v37 = vpop.permute.xlu1 %327 }
 0x314   :  { %v335_v38 = vmul.f32 %v328_v37, %v652_v44 }
 0x316   :  { %v337_v39 = vrot.slane %v335_v38, 4 }
 0x317   :  { %v333_v40 = vpop.permute.xlu1 %332 }
 0x318   :  { %v338_v41 = vadd.f32 %v337_v39, %v335_v38  ;;  %v336_v42 = vmul.f32 %v333_v40, %v657_v46 }
 0x31a   :  { %v339_v43 = vrot.slane %v338_v41, 2  ;;  %v343_v45 = vrot.slane %v336_v42, 4 }
 0x31c   :  { %v340_v47 = vadd.f32 %v339_v43, %v338_v41  ;;  %v344_v48 = vadd.f32 %v343_v45, %v336_v42 }
 0x31e   :  { %v341_v49 = vrot.slane %v340_v47, 1  ;;  %v345_v50 = vrot.slane %v344_v48, 2 }
 0x320   :  { %v346_v51 = vadd.f32 %v345_v50, %v344_v48  ;;  %v342_v52 = vadd.f32 %v341_v49, %v340_v47 }
 0x322   :  { %v347_v53 = vrot.slane %v346_v51, 1  ;;  %v349_v55 = vmul.f32 %v342_v52, %v342_v52 }
 0x324   :  { %v348_v54 = vadd.f32 %v347_v53, %v346_v51 }
 0x326   :  { %v350_v56 = vmul.f32 %v348_v54, %v348_v54 }
 0x328   :  { %v354_v44 = vsel %vm353_vm3, %v350_v56, %v349_v55 }
 0x329   :  { %v357_v57 = vsel %vm356_vm4, %v354_v44, 0.0 }
 0x32a   :  { %358 = vadd.xlane.f32.xlu0 %v357_v57 }
 0x3b3   :  { %v359_v58 = vpop.xlane.xlu0 %358 }
 0x3b4   :  { %v360_v46 = vmax.f32 %v359_v58, 1e-24 }
 0x3b6   :  { %515 = vrsqrt.f32 %v360_v46 }
 0x3c3   :  { %v516_v59 = vpop.eup %515 }
 0x3c4   :  { %v363_v60 = vrot.slane %v516_v59, 1  ;;  %v366_v62 = vmul.f32 %v516_v59, %v342_v52 }
 0x3c6   :  { %v367_v61 = vmul.f32 %v363_v60, %v348_v54 }
 0x3c8   :  { %v370_v63 = vrot.slane %v367_v61, 7 }
 0x3ca   :  { %v371_v0 = vsel %vm353_vm3, %v370_v63, %v366_v62 }
 0x3cb   :  { %373 = vst [vmem:[#allocation8] sm:$0x3] %v371_v0 }
 0x3cc   :  { %568 = shalt.err (!%p565_p0)
}
 0x3cd   :  { %383 = dma.vmem_to_hbm [thread:$0]  %s381_s7, 32, %s693_s8, [#allocation5]  }
 0x3ce   :  { %581 = dma.done.wait [#allocation5], 32  }
 0x3cf   :  { %582 = vsyncadd [#allocation5], 4294967264 }
 0x3d0   :  { %387 = vsyncpa [#allocation4], 1 }
 0x3d1   :  { %388 = vsyncpa [#allocation7], 1 }
 0x3d2   :  { %389 = vsyncpa [#allocation5], 1 }

</bundles_post_ra>
